<compile_context>
chip_gen: v7x
topology: tpu7x:2x2x1
jax: 0.10.0
libtpu: 0.0.40
codegen_flags: <defaults>
</compile_context>

<pallas_src>
import jax
import jax.numpy as jnp
from jax.experimental import pallas as pl
from jax.experimental.pallas import tpu as pltpu

_LANE = 1024                           # lane-dense slab width (multiple of 128)
_TARGET_TILE_BYTES = 2 * 1024 * 1024   # ~2 MiB tiles: near-roofline, safe on v5e/v6e/v7x


def _affine_kernel(params_ref, x_ref, z_ref):
    # params_ref: SMEM (2,) -> [scale = exp(alpha), shift = beta]
    scale = params_ref[0]
    shift = params_ref[1]
    z_ref[...] = (x_ref[...] * scale + shift).astype(z_ref.dtype)


def transformation_layer_forward(x, alpha, beta):
    """Forward pass of TransformationLayer.

    Args:
      x:     array of any shape/float dtype
      alpha: f32[1] (or scalar)
      beta:  f32[1] (or scalar)
    Returns:
      (z, log_det) with z = exp(alpha) * x + beta (same shape/dtype as x),
      log_det = -alpha.
    """
    orig_shape = x.shape
    dtype = x.dtype
    n = x.size
    itemsize = jnp.dtype(dtype).itemsize

    # Scalar prep outside the kernel: exp(alpha) once, not once per grid step.
    alpha_f = jnp.reshape(alpha, (-1,))[:1].astype(jnp.float32)
    beta_f = jnp.reshape(beta, (-1,))[:1].astype(jnp.float32)
    params = jnp.concatenate([jnp.exp(alpha_f), beta_f])  # (2,) [scale, shift]

    # Flatten to a lane-dense (rows, _LANE) slab; pick block_rows targeting ~2 MiB
    # tiles, and pad rows so every block (including the last) is full.
    rows = pl.cdiv(n, _LANE)
    target_rows = max(8, ((_TARGET_TILE_BYTES // (_LANE * itemsize)) // 8) * 8)
    if rows <= target_rows:
        block_rows = rows          # single full block == whole (padded) array
        padded_rows = rows
    else:
        block_rows = target_rows   # multiple of 8; _LANE is a multiple of 128
        padded_rows = pl.cdiv(rows, block_rows) * block_rows

    flat = jnp.ravel(x)
    pad = padded_rows * _LANE - n
    if pad:
        flat = jnp.pad(flat, (0, pad))
    x2d = flat.reshape(padded_rows, _LANE)

    grid = (padded_rows // block_rows,)

    z2d = pl.pallas_call(
        _affine_kernel,
        out_shape=jax.ShapeDtypeStruct((padded_rows, _LANE), dtype),
        grid=grid,
        in_specs=[
            pl.BlockSpec(memory_space=pltpu.MemorySpace.SMEM),        # [scale, shift]
            pl.BlockSpec((block_rows, _LANE), lambda i: (i, 0)),      # x tile
        ],
        out_specs=pl.BlockSpec((block_rows, _LANE), lambda i: (i, 0)),  # z tile
        compiler_params=pltpu.CompilerParams(
            dimension_semantics=("parallel",),   # shards across v7x's 2 TCs when grid > 1
        ),
    )(params, x2d)

    z = z2d.reshape(-1)[:n].reshape(orig_shape)
    # log_det is a scalar independent of x; plain JAX glue (matches torch: shape (1,)).
    log_det = -alpha_f
    return z, log_det


if __name__ == "__main__":
    key = jax.random.PRNGKey(0)
    k_x, k_a, k_b, k_x2 = jax.random.split(key, 4)

    # Small, deterministic inputs consistent with the (elementwise) module.
    x = jax.random.normal(k_x, (8, 256), dtype=jnp.float32)
    # Mirror torch.rand(1) init (uniform [0, 1)) deterministically.
    alpha = jax.random.uniform(k_a, (1,), dtype=jnp.float32)
    beta = jax.random.uniform(k_b, (1,), dtype=jnp.float32)

    z, log_det = transformation_layer_forward(x, alpha, beta)
    jax.block_until_ready((z, log_det))

    z_ref = jnp.exp(alpha) * x + beta
    assert z.shape == x.shape and z.dtype == x.dtype
    assert jnp.allclose(z, z_ref, atol=1e-6), "z mismatch"
    assert jnp.allclose(log_det, -alpha, atol=1e-6), "log_det mismatch"

    # Ragged shape: exercises the flatten + pad path (D not a multiple of 128).
    x2 = jax.random.normal(k_x2, (5, 37), dtype=jnp.float32)
    z2, log_det2 = transformation_layer_forward(x2, alpha, beta)
    jax.block_until_ready((z2, log_det2))
    assert jnp.allclose(z2, jnp.exp(alpha) * x2 + beta, atol=1e-6), "z mismatch (ragged)"
    assert jnp.allclose(log_det2, -alpha, atol=1e-6), "log_det mismatch (ragged)"

    print("KERNEL_OK")
</pallas_src>

<mosaic_0001>
module attributes {stable_mosaic.version = 11 : i64} {
  func.func @_affine_kernel(%arg0: i32, %arg1: memref<2xf32, #tpu.memory_space<smem>>, %arg2: memref<2x1024xf32, #tpu.memory_space<vmem>>, %arg3: memref<2x1024xf32, #tpu.memory_space<vmem>>) attributes {dimension_semantics = [#tpu.dimension_semantics<parallel>], iteration_bounds = array<i64: 1>, scalar_prefetch = 0 : i64, scratch_operands = 0 : i64, tpu.core_type = #tpu.core_type<tc>, window_params = [{transform_indices = @transform_0, window_bounds = array<i64: 2>}, {transform_indices = @transform_1, window_bounds = array<i64: 2, 1024>}, {transform_indices = @transform_2, window_bounds = array<i64: 2, 1024>}]} {
    %c0 = arith.constant 0 : index
    %0 = memref.load %arg1[%c0] : memref<2xf32, #tpu.memory_space<smem>>
    %c1 = arith.constant 1 : index
    %1 = memref.load %arg1[%c1] : memref<2xf32, #tpu.memory_space<smem>>
    %c0_0 = arith.constant 0 : index
    %c0_1 = arith.constant 0 : index
    %2 = vector.load %arg2[%c0_0, %c0_1] : memref<2x1024xf32, #tpu.memory_space<vmem>>, vector<2x1024xf32>
    %3 = vector.broadcast %0 : f32 to vector<2x1024xf32>
    %4 = arith.mulf %2, %3 : vector<2x1024xf32>
    %5 = vector.broadcast %1 : f32 to vector<2x1024xf32>
    %6 = arith.addf %4, %5 : vector<2x1024xf32>
    %c0_2 = arith.constant 0 : index
    %c0_3 = arith.constant 0 : index
    %7 = vector.load %arg3[%c0_2, %c0_3] : memref<2x1024xf32, #tpu.memory_space<vmem>>, vector<2x1024xf32>
    tpu.vector_store %arg3[%c0_2, %c0_3], %6 {strides = array<i32>} : memref<2x1024xf32, #tpu.memory_space<vmem>>, vector<2x1024xf32>,
    return
  }
  func.func @transform_0(%arg0: i32) -> i32 {
    %c0_i32 = arith.constant 0 : i32
    %c0_i32_0 = arith.constant 0 : i32
    return %c0_i32 : i32
  }
  func.func @transform_1(%arg0: i32) -> (i32, i32) {
    %c0_i32 = arith.constant 0 : i32
    %c0_i32_0 = arith.constant 0 : i32
    return %arg0, %c0_i32 : i32, i32
  }
  func.func @transform_2(%arg0: i32) -> (i32, i32) {
    %c0_i32 = arith.constant 0 : i32
    %c0_i32_0 = arith.constant 0 : i32
    return %arg0, %c0_i32 : i32, i32
  }
}

</mosaic_0001>

<bundles_post_ra>
// kernel: tpu_custom_call.1
= control target key start
LH: loop header
LB: loop body
LE: loop exit
PB: predicated region body
PF: predicated region fallthrough
CT: control target
= control target key end

     0   :  { %7 = vsyncpa [#allocation5], 0  ;;  %s181_s0 = inlined_call_operand.hbm [shape: f32[2], index: 0, kind: input, shape index: {}]   ;;  %s182_s1 = inlined_call_operand.hbm [shape: f32[2,1024], index: 1, kind: input, shape index: {}]   ;;  %s183_s2 = inlined_call_operand.hbm [shape: f32[2,1024], index: 2, kind: output, shape index: {}]  }
   0x1   :  { %8 = vsyncpa [#allocation3], 0 }
   0x2   :  { %9 = vsyncpa [#allocation4], 0  ;;  %s67_s11 = scalar_lea.hbm %s181_s0, 16 }
   0x3   :  { %p68_p0 = scmp.ne.s32.totalorder %s181_s0, %s67_s11  ;;  %p71_p1 = scmp.lt.u32.totalorder %s67_s11, %s181_s0 }
   0x5   :  { %p73_p2 = pnand %p71_p1, %p68_p0 }
   0x7   :  { %76 = shalt.err (!%p73_p2)
}
   0x8   :  { %s127_s16 = smov [#allocation2]   ;;  %s128_s19 = smov [#allocation6]  }
   0x9   :  { %17 = dma.hbm_to_smem %s181_s0, 16, %s127_s16, [#allocation5]  }
   0xa   :  { %s24_s20 = sshll.u32 %s128_s19, 4  ;;  %s77_s23 = scalar_lea.hbm %s182_s1, 256  ;;  %s25_s20 = int_to_ptr.vmem [resolvable:$true] %s24_s20 }
   0xb   :  { %p78_p3 = scmp.ne.s32.totalorder %s182_s1, %s77_s23  ;;  %p81_p4 = scmp.lt.u32.totalorder %s77_s23, %s182_s1 }
   0xd   :  { %p83_p5 = pnand %p81_p4, %p78_p3 }
   0xf   :  { %86 = shalt.err (!%p83_p5)
}
  0x10   :  { %s87_s28 = scalar_lea.vmem %s25_s20, 256  ;;  %p92_p7 = scmp.lt.s32.totalorder %s25_s20, %s25_s20 }
  0x11   :  { %p88_p6 = scmp.ne.s32.totalorder %s25_s20, %s87_s28  ;;  %p93_p8 = scmp.lt.s32.totalorder %s87_s28, %s87_s28 }
  0x13   :  { %p94_p9 = por %p93_p8, %p92_p7 }
  0x15   :  { %p95_p10 = pnand %p94_p9, %p88_p6 }
  0x17   :  { %98 = shalt.err (!%p95_p10)
}
  0x18   :  { %27 = dma.hbm_to_vmem [thread:$0]  %s182_s1, 256, %s25_s20, [#allocation3]  }
  0x19   :  { %121 = dma.done.wait [#allocation5], 16  }
  0x1a   :  { %122 = vsyncadd [#allocation5], 4294967280 }
  0x1b   :  { %123 = dma.done.wait [#allocation3], 256  }
  0x1c   :  { %124 = vsyncadd [#allocation3], 4294967040 }
  0x1d   :  { %34 = sfence }
  0x1e   :  { %s35_s30 = sld [smem:[#allocation2]]  ;;  %s63_s3 = sld [smem:[#allocation2 + $0x1]]  ;;  %v37_v0 = vld [vmem:[#allocation6] sm:$0xff]  ;;  %v38_v1 = vld [vmem:[#allocation6 + $0x8] sm:$0xff] }
  0x1f   :  { %s129_s4 = smov [#allocation7]  }
  0x20   :  { %s53_s5 = sshll.u32 %s129_s4, 4  ;;  %s54_s5 = int_to_ptr.vmem [resolvable:$true] %s53_s5 }
  0x21   :  { %s99_s1 = scalar_lea.vmem %s54_s5, 256  ;;  %p104_p12 = scmp.lt.s32.totalorder %s54_s5, %s54_s5 }
  0x22   :  { %p100_p11 = scmp.ne.s32.totalorder %s54_s5, %s99_s1  ;;  %p105_p13 = scmp.lt.s32.totalorder %s99_s1, %s99_s1 }
  0x24   :  { %v39_v2 = vstv %s35_s30  ;;  %v42_v3 = vstv %s63_s3  ;;  %p106_p0 = por %p105_p13, %p104_p12 }
  0x25   :  { %v40_v4 = vmul.f32 %v39_v2, %v37_v0  ;;  %v41_v5 = vmul.f32 %v39_v2, %v38_v1 }
  0x26   :  { %p107_p1 = pnand %p106_p0, %p100_p11 }
  0x27   :  { %v43_v6 = vadd.f32 %v42_v3, %v40_v4  ;;  %v44_v7 = vadd.f32 %v42_v3, %v41_v5 }
  0x29   :  { %45 = vst [vmem:[#allocation7] sm:$0xff] %v43_v6  ;;  %46 = vst [vmem:[#allocation7 + $0x8] sm:$0xff] %v44_v7 }
  0x2a   :  { %110 = shalt.err (!%p107_p1)
}
  0x2b   :  { %s111_s8 = scalar_lea.hbm %s183_s2, 256 }
  0x2c   :  { %p112_p2 = scmp.ne.s32.totalorder %s183_s2, %s111_s8  ;;  %p115_p3 = scmp.lt.u32.totalorder %s111_s8, %s183_s2 }
  0x2e   :  { %p117_p4 = pnand %p115_p3, %p112_p2 }
  0x30   :  { %120 = shalt.err (!%p117_p4)
}
  0x31   :  { %56 = dma.vmem_to_hbm [thread:$0]  %s54_s5, 256, %s183_s2, [#allocation4]  }
  0x32   :  { %125 = dma.done.wait [#allocation4], 256  }
  0x33   :  { %126 = vsyncadd [#allocation4], 4294967040 }
  0x34   :  { %60 = vsyncpa [#allocation3], 1 }
  0x35   :  { %61 = vsyncpa [#allocation4], 1 }
  0x36   :  { %62 = vsyncpa [#allocation5], 1 }

</bundles_post_ra>
